<compile_context>
chip_gen: v5e
topology: v5e:2x2
jax: 0.10.0
libtpu: 0.0.40
codegen_flags: <defaults>
</compile_context>

<pallas_src>
import functools

import jax
import jax.numpy as jnp
from jax import lax
from jax.experimental import pallas as pl
from jax.experimental.pallas import tpu as pltpu

VMEM_SPEC = pl.BlockSpec(memory_space=pltpu.MemorySpace.VMEM)


def _round_up(x, m):
    return ((x + m - 1) // m) * m


def _vmem_limit_bytes():
    # Scale the scoped-VMEM limit with physical VMEM:
    #   v5e/v6e (128 MiB) -> 96 MiB ; v7x (64 MiB) -> 48 MiB ; fallback 48 MiB.
    try:
        phys = int(pltpu.get_tpu_info().vmem_capacity_bytes)
    except Exception:
        phys = 64 * 1024 * 1024
    return max(32 * 1024 * 1024, min(phys * 3 // 4, 112 * 1024 * 1024))


_VMEM_LIMIT = _vmem_limit_bytes()


# -----------------------------------------------------------------------------
# Tiled matmul + bias (bf16 operands / f32 acc / bf16 out).  Weights are
# pre-padded + pre-cast at init (prep_linear); only activations are padded here.
# Used for the hoisted LSTM input projection of BOTH directions at once.
# -----------------------------------------------------------------------------
def matmul_bias_kernel(x_ref, w_ref, b_ref, o_ref, acc_ref):
    @pl.when(pl.program_id(2) == 0)
    def _():
        acc_ref[...] = jnp.zeros_like(acc_ref)

    acc_ref[...] += jnp.dot(x_ref[...], w_ref[...],
                            preferred_element_type=jnp.float32)

    @pl.when(pl.program_id(2) == pl.num_programs(2) - 1)
    def _():
        o_ref[...] = (acc_ref[...] + b_ref[...]).astype(o_ref.dtype)


def prep_linear(w_t, b, *, tk_max=1280, tn_max=1024):
    """One-time weight prep (init only): pad W/(b) to tile multiples, cast bf16."""
    k, n = w_t.shape
    tk = min(tk_max, _round_up(k, 128))
    tn = min(tn_max, _round_up(n, 128))
    kp, np_ = _round_up(k, tk), _round_up(n, tn)
    wb = jnp.pad(w_t.astype(jnp.float32),
                 ((0, kp - k), (0, np_ - n))).astype(jnp.bfloat16)
    bb = jnp.pad(b.astype(jnp.float32), (0, np_ - n)).reshape(1, np_)
    return dict(w=wb, b=bb, n=n, tk=tk, tn=tn)


def matmul_bias(x, prep, *, tm=256, out_dtype=jnp.bfloat16):
    """(M, K) @ W + b -> (M, N) in out_dtype; W/b pre-padded at init."""
    m, k = x.shape
    wb, bb = prep["w"], prep["b"]
    kp, np_ = wb.shape
    tk, tn, n = prep["tk"], prep["tn"], prep["n"]
    tm = min(tm, _round_up(m, 8))
    mp = _round_up(m, tm)

    xb = x.astype(jnp.bfloat16)
    if mp > m or kp > k:
        xb = jnp.pad(xb, ((0, mp - m), (0, kp - k)))

    grid = (mp // tm, np_ // tn, kp // tk)
    out = pl.pallas_call(
        matmul_bias_kernel,
        out_shape=jax.ShapeDtypeStruct((mp, np_), out_dtype),
        grid=grid,
        in_specs=[pl.BlockSpec((tm, tk), lambda i, j, kk: (i, kk)),
                  pl.BlockSpec((tk, tn), lambda i, j, kk: (kk, j)),
                  pl.BlockSpec((1, tn), lambda i, j, kk: (0, j))],
        out_specs=pl.BlockSpec((tm, tn), lambda i, j, kk: (i, j)),
        scratch_shapes=[pltpu.VMEM((tm, tn), jnp.float32)],
        compiler_params=pltpu.CompilerParams(
            dimension_semantics=("parallel", "parallel", "arbitrary"),
            vmem_limit_bytes=_VMEM_LIMIT),
        cost_estimate=pl.CostEstimate(
            flops=2 * mp * np_ * kp,
            transcendentals=0,
            bytes_accessed=mp * kp * 2 + kp * np_ * 2 + mp * np_ * 2),
    )(xb, wb, bb)
    if mp > m or np_ > n:
        out = out[:m, :n]
    return out


# -----------------------------------------------------------------------------
# CDIL_Block in NCL layout: circular dilated conv1d (ks=3) + ReLU + BN + residual.
# Fused single MXU pass per batch element: (2Cout, 3Cin) @ (3Cin, L).
# All elementwise / BN work is lane-dense on L.
# -----------------------------------------------------------------------------
def cdil_block_kernel(x_ref, w_ref, b_ref, gamma_ref, beta_ref, o_ref,
                      *, dilation, c_out, eps):
    x = x_ref[...]                                   # (N, Cin, L) f32, NCL layout
    n, c_in, l = x.shape
    d = dilation

    def circshift(a, s):                             # y[..., t] = a[..., (t+s) % L]
        s = s % l
        if s == 0:
            return a
        return jnp.concatenate([a[..., s:], a[..., :s]], axis=-1)

    # Circular taps stay on the lane (L) axis; then one bf16 cast for the MXU.
    x3 = jnp.concatenate([circshift(x, l - d), x, circshift(x, d)],
                         axis=1).astype(jnp.bfloat16)            # (N, 3Cin, L)

    # Fused conv + 1x1 residual: per-batch (2Cout, 3Cin) @ (3Cin, L).
    w = jnp.broadcast_to(w_ref[...], (n,) + w_ref.shape)          # (N, 2Cout, 3Cin)
    y = lax.dot_general(w, x3, (((2,), (1,)), ((0,), (0,))),
                        preferred_element_type=jnp.float32)       # (N, 2Cout, L)
    y = y + b_ref[...]
    conv_out = y[:, :c_out, :]
    res = y[:, c_out:, :]                            # 1x1 conv / identity residual

    # cbam(y_conv1) is discarded in the original forward -> skipped.
    out = jnp.maximum(conv_out, 0.0)                 # ReLU (f32)

    # BatchNorm1d, training-mode batch statistics over (N, L) per channel (f32).
    mean = jnp.mean(out, axis=(0, 2), keepdims=True)
    var = jnp.mean(jnp.square(out - mean), axis=(0, 2), keepdims=True)
    bn = (out - mean) * lax.rsqrt(var + eps) * gamma_ref[...] + beta_ref[...]

    o_ref[...] = (bn + res).astype(o_ref.dtype)


def cdil_block_apply(x_ncl, p):
    n, c_in, l = x_ncl.shape
    c_out = p["gamma"].shape[0]
    dil = int(p["dilation"])
    if dil >= l:
        raise ValueError(f"dilation {dil} >= sequence length {l}: circular taps "
                         "would alias (matches PyTorch circular-pad constraint).")
    kern = functools.partial(cdil_block_kernel, dilation=dil, c_out=c_out, eps=1e-5)
    # TODO(synk): grid over N/L with a two-pass (sum/sumsq) BN + halo-based circular
    # indexing if conv activations outgrow VMEM (matters first on v7x's 64 MiB).
    return pl.pallas_call(
        kern,
        out_shape=jax.ShapeDtypeStruct((n, c_out, l), jnp.float32),
        in_specs=[VMEM_SPEC] * 5,
        out_specs=VMEM_SPEC,
        compiler_params=pltpu.CompilerParams(vmem_limit_bytes=_VMEM_LIMIT),
    )(x_ncl, p["w_fused"], p["b_fused"], p["gamma"], p["beta"])


# -----------------------------------------------------------------------------
# LSTM recurrence: both directions in one call (grid=(2,), "parallel" -> both TCs
# on v7x).  Only W_hh is resident (bf16); the input projection is precomputed
# (bf16 gates).  Direction is selected purely by lane-dim BlockSpecs, so there is
# no gates transpose and no per-layer hidden slice/concat.
# -----------------------------------------------------------------------------
def lstm_rec_kernel(gx_ref, whh_ref, o_ref, h_ref, c_ref):
    # gx: (T, N, 4*Hp) bf16, whh: (Hp, 4*Hp) bf16, o: (T, N, Hp) f32
    rev = pl.program_id(0) > 0
    t_steps = gx_ref.shape[0]
    hp = whh_ref.shape[0]

    h_ref[...] = jnp.zeros_like(h_ref)
    c_ref[...] = jnp.zeros_like(c_ref)
    whh = whh_ref[...]

    def step(t, carry):
        tt = jnp.where(rev, t_steps - 1 - t, t)
        gates = gx_ref[tt].astype(jnp.float32) + jnp.dot(
            h_ref[...].astype(jnp.bfloat16), whh,
            preferred_element_type=jnp.float32)
        i_g = jax.nn.sigmoid(gates[:, 0:hp])
        f_g = jax.nn.sigmoid(gates[:, hp:2 * hp])
        g_g = jnp.tanh(gates[:, 2 * hp:3 * hp])
        o_g = jax.nn.sigmoid(gates[:, 3 * hp:4 * hp])
        c_new = f_g * c_ref[...] + i_g * g_g
        h_new = o_g * jnp.tanh(c_new)
        c_ref[...] = c_new
        h_ref[...] = h_new
        o_ref[tt] = h_new.astype(o_ref.dtype)
        return carry

    # T (=32) is short & fixed: full unroll gives the LLO scheduler visibility to
    # overlap gx loads / o stores / EUP work with the next step's MXU pushes.
    lax.fori_loop(0, t_steps, step, 0, unroll=True)


def lstm_layer_apply(x_tnf, layer, hidden_pad):
    t, nb, f = x_tnf.shape
    g4 = 4 * hidden_pad

    # Hoisted input projection for BOTH directions: one tiled, pipelined matmul.
    gates = matmul_bias(x_tnf.reshape(t * nb, f), layer["proj"])   # (T*N, 2*g4) bf16
    gates = gates.reshape(t, nb, 2 * g4)   # no transpose: lane BlockSpec picks dir

    out = pl.pallas_call(
        lstm_rec_kernel,
        out_shape=jax.ShapeDtypeStruct((t, nb, 2 * hidden_pad), jnp.float32),
        grid=(2,),
        in_specs=[pl.BlockSpec((t, nb, g4), lambda d: (0, 0, d)),
                  pl.BlockSpec((None, hidden_pad, g4), lambda d: (d, 0, 0))],
        out_specs=pl.BlockSpec((t, nb, hidden_pad), lambda d: (0, 0, d)),
        scratch_shapes=[pltpu.VMEM((nb, hidden_pad), jnp.float32),
                        pltpu.VMEM((nb, hidden_pad), jnp.float32)],
        compiler_params=pltpu.CompilerParams(
            dimension_semantics=("parallel",),
            vmem_limit_bytes=_VMEM_LIMIT),
    )(gates, layer["whh"])
    # (T, N, 2*Hp): forward h in lanes [0:H], backward in [Hp:Hp+H]; pads stay 0.
    return out


# -----------------------------------------------------------------------------
# Head: mean over L of (y_conv1 + y_conv2) + classifier Linear + SVM head.
# Gridded over batch; per-step blocks are lane-dense (L / 2*Hp on lanes).
# -----------------------------------------------------------------------------
def head_kernel(y1_ref, h_ref, wc_ref, bc_ref, ws_ref, bs_ref, o_ref, *, inv_l):
    i = pl.program_id(0)

    @pl.when(i == 0)
    def _():
        o_ref[...] = jnp.zeros_like(o_ref)

    # mean over L of (y_conv1 + y_conv2); padded LSTM lanes are exactly zero.
    f1 = jnp.sum(y1_ref[...], axis=-1)               # (1, C)
    f2 = jnp.sum(h_ref[...], axis=-1)                # (1, C)   (T == C)
    feat = (f1 + f2) * inv_l
    logits = jnp.dot(feat, wc_ref[...],
                     preferred_element_type=jnp.float32) + bc_ref[...]
    scores = jnp.dot(logits, ws_ref[...],
                     preferred_element_type=jnp.float32) + bs_ref[...]
    row = lax.broadcasted_iota(jnp.int32, o_ref.shape, 0)
    o_ref[...] += jnp.where(row == i, scores, 0.0).astype(o_ref.dtype)


def head_apply(y1_ncl, h_tnf, cls, svm, seq_l):
    n, c, l = y1_ncl.shape
    t, _, hp2 = h_tnf.shape
    cls_out = cls["w"].shape[1]
    num_classes = svm["w"].shape[1]

    # Small one-time relayout so the head can be gridded cleanly over batch
    # (leading dims swap only; the lane axis (2*Hp) is untouched).
    h_ntf = jnp.transpose(h_tnf, (1, 0, 2))          # (N, T, 2*Hp)

    kern = functools.partial(head_kernel, inv_l=1.0 / float(seq_l))
    return pl.pallas_call(
        kern,
        out_shape=jax.ShapeDtypeStruct((n, num_classes), jnp.float32),
        grid=(n,),
        in_specs=[pl.BlockSpec((1, c, l), lambda i: (i, 0, 0)),
                  pl.BlockSpec((1, t, hp2), lambda i: (i, 0, 0)),
                  pl.BlockSpec((c, cls_out), lambda i: (0, 0)),
                  pl.BlockSpec((1, cls_out), lambda i: (0, 0)),
                  pl.BlockSpec((cls_out, num_classes), lambda i: (0, 0)),
                  pl.BlockSpec((1, num_classes), lambda i: (0, 0))],
        out_specs=pl.BlockSpec((n, num_classes), lambda i: (0, 0)),
        compiler_params=pltpu.CompilerParams(
            dimension_semantics=("arbitrary",),
            vmem_limit_bytes=_VMEM_LIMIT),
    )(y1_ncl, h_ntf, cls["w"], cls["b"], svm["w"], svm["b"])


# -----------------------------------------------------------------------------
# Parameter init: deterministic synthetic weights, with ALL kernel-side weight
# preprocessing (fusion, gate/lane padding, bf16 casts, transposes) done here.
# -----------------------------------------------------------------------------
def _gate_pad_cols(w_t, h, hp):
    # (rows, 4H) -> (rows, 4*Hp): each gate block right-padded with zero columns.
    parts = [jnp.pad(w_t[:, g * h:(g + 1) * h], ((0, 0), (0, hp - h)))
             for g in range(4)]
    return jnp.concatenate(parts, axis=1)


def init_params(key, dim_in, hidden_channels, seq_len, output_size,
                ks=3, lstm_layers=6, num_classes=6):
    assert ks == 3, "fused CDIL block assumes kernel_size=3 (module default)"
    assert seq_len % 2 == 0, "Bi-LSTM hidden = seq_len // 2 requires even seq_len"
    params = {}

    # ---- conv blocks (weight_norm folded; conv + residual fused into one W) ----
    conv = []
    c_prev = dim_in
    for i, c_out in enumerate(hidden_channels):
        key, k1, k2, k3, k4 = jax.random.split(key, 5)
        w = 0.01 * jax.random.normal(k1, (c_out, c_prev, ks), jnp.float32)
        b = 0.01 * jax.random.normal(k2, (c_out,), jnp.float32)
        if c_prev != c_out:
            wres = 0.01 * jax.random.normal(k3, (c_out, c_prev), jnp.float32)
            bres = 0.01 * jax.random.normal(k4, (c_out,), jnp.float32)
        else:
            wres = jnp.eye(c_out, dtype=jnp.float32)      # identity residual
            bres = jnp.zeros((c_out,), jnp.float32)
        zblk = jnp.zeros((c_out, c_prev), jnp.float32)
        # rows = [conv_out ; residual], cols = taps x Cin  ->  (2Cout, 3Cin) bf16
        w_fused = jnp.concatenate([
            jnp.concatenate([w[:, :, 0], zblk], axis=0),
            jnp.concatenate([w[:, :, 1], wres], axis=0),
            jnp.concatenate([w[:, :, 2], zblk], axis=0)],
            axis=1).astype(jnp.bfloat16)
        b_fused = jnp.concatenate([b, bres]).reshape(2 * c_out, 1)
        conv.append(dict(w_fused=w_fused, b_fused=b_fused,
                         gamma=jnp.ones((c_out, 1), jnp.float32),
                         beta=jnp.zeros((c_out, 1), jnp.float32),
                         dilation=2 ** i))
        c_prev = c_out
    params["conv"] = conv

    # ---- Bi-LSTM (hidden padded to a lane tile; padding kept between layers) ----
    hidden = seq_len // 2            # original: 1250 (input_size 2500)
    hidden_pad = _round_up(hidden, 128)
    g4 = 4 * hidden_pad
    scale = 1.0 / float(hidden) ** 0.5
    feat = seq_len
    lstm = []
    for layer_idx in range(lstm_layers):
        wih_cols, bias_cols, whh_stack = [], [], []
        for _ in range(2):           # [forward, backward]
            key, k1, k2, k3, k4 = jax.random.split(key, 5)
            wih = scale * jax.random.normal(k1, (4 * hidden, feat), jnp.float32)
            whh = scale * jax.random.normal(k2, (4 * hidden, hidden), jnp.float32)
            bih = scale * jax.random.normal(k3, (4 * hidden,), jnp.float32)
            bhh = scale * jax.random.normal(k4, (4 * hidden,), jnp.float32)

            wih_g = _gate_pad_cols(wih.T, hidden, hidden_pad)       # (feat, g4)
            if layer_idx > 0:
                # Runtime input keeps the Hp-padded layout [h_fwd | 0 | h_bwd | 0]:
                # scatter W_ih rows to the valid positions, zeros elsewhere.
                w_full = jnp.zeros((2 * hidden_pad, g4), jnp.float32)
                w_full = w_full.at[:hidden].set(wih_g[:hidden])
                w_full = w_full.at[hidden_pad:hidden_pad + hidden].set(wih_g[hidden:])
                wih_g = w_full
            wih_cols.append(wih_g)
            bias_cols.append(_gate_pad_cols((bih + bhh).reshape(1, -1),
                                            hidden, hidden_pad).reshape(-1))
            whh_g = _gate_pad_cols(whh.T, hidden, hidden_pad)       # (H, g4)
            whh_g = jnp.pad(whh_g, ((0, hidden_pad - hidden), (0, 0)))
            whh_stack.append(whh_g.astype(jnp.bfloat16))

        wih_all = jnp.concatenate(wih_cols, axis=1)      # (F_in, 2*g4)
        bias_all = jnp.concatenate(bias_cols, axis=0)    # (2*g4,)
        lstm.append(dict(proj=prep_linear(wih_all, bias_all),
                         whh=jnp.stack(whh_stack, axis=0)))   # (2, Hp, g4) bf16
        feat = 2 * hidden
    params["lstm"] = lstm
    params["hidden"] = hidden
    params["hidden_pad"] = hidden_pad

    # ---- classifier + SVM head (pre-transposed) ----
    c_last = hidden_channels[-1]     # must be 32 (BatchNorm1d(32), Linear(32, .))
    key, k1, k2, k3, k4 = jax.random.split(key, 5)
    params["classifier"] = dict(
        w=(0.1 * jax.random.normal(k1, (output_size, c_last), jnp.float32)).T,
        b=(0.1 * jax.random.normal(k2, (output_size,), jnp.float32)).reshape(1, -1))
    # TODO(synk): SVMClassifier is not defined in the source; modeled as Linear(output_size, 6).
    params["svm"] = dict(
        w=(0.1 * jax.random.normal(k3, (num_classes, output_size), jnp.float32)).T,
        b=(0.1 * jax.random.normal(k4, (num_classes,), jnp.float32)).reshape(1, -1))
    return params


def cdil_cnn_forward(x_ncl, params):
    # x_ncl: (N, C_in, L), PyTorch NCW layout — kept as-is (conv runs in NCL).
    x = x_ncl.astype(jnp.float32)
    for p in params["conv"]:
        x = cdil_block_apply(x, p)
    y_conv1 = x                                           # (N, 32, L)

    n, c, l = y_conv1.shape
    if l != 2 * params["hidden"]:
        raise ValueError("sequence length must equal 2 * LSTM hidden size")

    # Bi-LSTM: PyTorch treats y_conv1 (N, 32, L) as (batch, seq=32, feature=L).
    h = jnp.transpose(y_conv1, (1, 0, 2))                 # (T=32, N, L)
    for layer in params["lstm"]:
        # Padded-hidden invariant: padded lanes of h stay exactly 0 because the
        # padded W_ih/W_hh rows & columns and padded biases are 0 and the initial
        # state is 0 (tanh(0)=0 keeps padded c/h at 0 every step).  Do not feed a
        # nonzero initial state without revisiting this.
        h = lstm_layer_apply(h, layer, params["hidden_pad"])   # (T, N, 2*Hp)

    return head_apply(y_conv1, h, params["classifier"], params["svm"], l)


if __name__ == "__main__":
    N, C_IN, L = 2, 4, 16                # batch, input channels, sequence length
    HIDDEN_CHANNELS = [32, 32]           # fixed at 32 by BatchNorm1d(32)/Linear(32,.)
    OUTPUT_SIZE = 6

    key = jax.random.PRNGKey(0)
    key, xkey = jax.random.split(key)
    x = jax.random.normal(xkey, (N, C_IN, L), jnp.float32)

    params = init_params(key, C_IN, HIDDEN_CHANNELS, L, OUTPUT_SIZE)
    y = cdil_cnn_forward(x, params)
    y = jax.block_until_ready(y)
    assert y.shape == (N, 6) and bool(jnp.all(jnp.isfinite(y)))
    print("KERNEL_OK")
</pallas_src>

<mosaic_0001>
module attributes {stable_mosaic.version = 11 : i64} {
  func.func @cdil_block_kernel(%arg0: memref<2x4x16xf32, #tpu.memory_space<vmem>>, %arg1: memref<64x12xbf16, #tpu.memory_space<vmem>>, %arg2: memref<64x1xf32, #tpu.memory_space<vmem>>, %arg3: memref<32x1xf32, #tpu.memory_space<vmem>>, %arg4: memref<32x1xf32, #tpu.memory_space<vmem>>, %arg5: memref<2x32x16xf32, #tpu.memory_space<vmem>>) attributes {dimension_semantics = [], scalar_prefetch = 0 : i64, scratch_operands = 0 : i64, tpu.core_type = #tpu.core_type<tc>} {
    %c0 = arith.constant 0 : index
    %c0_0 = arith.constant 0 : index
    %c0_1 = arith.constant 0 : index
    %0 = vector.load %arg0[%c0, %c0_0, %c0_1] : memref<2x4x16xf32, #tpu.memory_space<vmem>>, vector<2x4x16xf32>
    %1 = vector.extract_strided_slice %0 {offsets = [0, 0, 15], sizes = [2, 4, 1], strides = [1, 1, 1]} : vector<2x4x16xf32> to vector<2x4x1xf32>
    %2 = vector.extract_strided_slice %0 {offsets = [0, 0, 0], sizes = [2, 4, 15], strides = [1, 1, 1]} : vector<2x4x16xf32> to vector<2x4x15xf32>
    %3 = tpu.concatenate %1, %2 in 2 : vector<2x4x1xf32>, vector<2x4x15xf32> -> vector<2x4x16xf32>
    %4 = vector.extract_strided_slice %0 {offsets = [0, 0, 1], sizes = [2, 4, 15], strides = [1, 1, 1]} : vector<2x4x16xf32> to vector<2x4x15xf32>
    %5 = vector.extract_strided_slice %0 {offsets = [0, 0, 0], sizes = [2, 4, 1], strides = [1, 1, 1]} : vector<2x4x16xf32> to vector<2x4x1xf32>
    %6 = tpu.concatenate %4, %5 in 2 : vector<2x4x15xf32>, vector<2x4x1xf32> -> vector<2x4x16xf32>
    %7 = tpu.concatenate %3, %0, %6 in 1 : vector<2x4x16xf32>, vector<2x4x16xf32>, vector<2x4x16xf32> -> vector<2x12x16xf32>
    %8 = arith.truncf %7 : vector<2x12x16xf32> to vector<2x12x16xbf16>
    %c0_2 = arith.constant 0 : index
    %c0_3 = arith.constant 0 : index
    %9 = vector.load %arg1[%c0_2, %c0_3] : memref<64x12xbf16, #tpu.memory_space<vmem>>, vector<64x12xbf16>
    %10 = vector.shape_cast %9 : vector<64x12xbf16> to vector<1x64x12xbf16>
    %11 = vector.broadcast %10 : vector<1x64x12xbf16> to vector<2x64x12xbf16>
    %cst = arith.constant dense<0.000000e+00> : vector<2x64x16xf32>
    %12 = tpu.matmul %11, %8, %cst {dimension_numbers = #tpu.dot_dimension_numbers<[2], [1], [1], [2], [0, 0, 0, 1, 1, 2], [0], [0]>} : vector<2x64x12xbf16>, vector<2x12x16xbf16>, vector<2x64x16xf32> -> vector<2x64x16xf32>
    %c0_4 = arith.constant 0 : index
    %c0_5 = arith.constant 0 : index
    %13 = vector.load %arg2[%c0_4, %c0_5] : memref<64x1xf32, #tpu.memory_space<vmem>>, vector<64x1xf32>
    %14 = vector.shape_cast %13 : vector<64x1xf32> to vector<1x64x1xf32>
    %15 = vector.broadcast %14 : vector<1x64x1xf32> to vector<2x64x16xf32>
    %16 = arith.addf %12, %15 : vector<2x64x16xf32>
    %17 = vector.extract_strided_slice %16 {offsets = [0, 0, 0], sizes = [2, 32, 16], strides = [1, 1, 1]} : vector<2x64x16xf32> to vector<2x32x16xf32>
    %18 = vector.extract_strided_slice %16 {offsets = [0, 32, 0], sizes = [2, 32, 16], strides = [1, 1, 1]} : vector<2x64x16xf32> to vector<2x32x16xf32>
    %cst_6 = arith.constant 0.000000e+00 : f32
    %19 = vector.broadcast %cst_6 : f32 to vector<2x32x16xf32>
    %20 = arith.maximumf %17, %19 : vector<2x32x16xf32>
    %cst_7 = arith.constant dense<0.000000e+00> : vector<32xf32>
    %21 = vector.multi_reduction <add>, %20, %cst_7 [0, 2] : vector<2x32x16xf32> to vector<32xf32>
    %22 = vector.shape_cast %21 : vector<32xf32> to vector<1x32x1xf32>
    %cst_8 = arith.constant 3.200000e+01 : f32
    %23 = vector.broadcast %cst_8 : f32 to vector<1x32x1xf32>
    %24 = arith.divf %22, %23 : vector<1x32x1xf32>
    %25 = vector.broadcast %24 : vector<1x32x1xf32> to vector<2x32x16xf32>
    %26 = arith.subf %20, %25 : vector<2x32x16xf32>
    %27 = arith.mulf %26, %26 : vector<2x32x16xf32>
    %cst_9 = arith.constant dense<0.000000e+00> : vector<32xf32>
    %28 = vector.multi_reduction <add>, %27, %cst_9 [0, 2] : vector<2x32x16xf32> to vector<32xf32>
    %29 = vector.shape_cast %28 : vector<32xf32> to vector<1x32x1xf32>
    %cst_10 = arith.constant 3.200000e+01 : f32
    %30 = vector.broadcast %cst_10 : f32 to vector<1x32x1xf32>
    %31 = arith.divf %29, %30 : vector<1x32x1xf32>
    %32 = vector.broadcast %24 : vector<1x32x1xf32> to vector<2x32x16xf32>
    %33 = arith.subf %20, %32 : vector<2x32x16xf32>
    %cst_11 = arith.constant 9.99999974E-6 : f32
    %34 = vector.broadcast %cst_11 : f32 to vector<1x32x1xf32>
    %35 = arith.addf %31, %34 : vector<1x32x1xf32>
    %36 = math.rsqrt %35 : vector<1x32x1xf32>
    %37 = vector.broadcast %36 : vector<1x32x1xf32> to vector<2x32x16xf32>
    %38 = arith.mulf %33, %37 : vector<2x32x16xf32>
    %c0_12 = arith.constant 0 : index
    %c0_13 = arith.constant 0 : index
    %39 = vector.load %arg3[%c0_12, %c0_13] : memref<32x1xf32, #tpu.memory_space<vmem>>, vector<32x1xf32>
    %40 = vector.shape_cast %39 : vector<32x1xf32> to vector<1x32x1xf32>
    %41 = vector.broadcast %40 : vector<1x32x1xf32> to vector<2x32x16xf32>
    %42 = arith.mulf %38, %41 : vector<2x32x16xf32>
    %c0_14 = arith.constant 0 : index
    %c0_15 = arith.constant 0 : index
    %43 = vector.load %arg4[%c0_14, %c0_15] : memref<32x1xf32, #tpu.memory_space<vmem>>, vector<32x1xf32>
    %44 = vector.shape_cast %43 : vector<32x1xf32> to vector<1x32x1xf32>
    %45 = vector.broadcast %44 : vector<1x32x1xf32> to vector<2x32x16xf32>
    %46 = arith.addf %42, %45 : vector<2x32x16xf32>
    %47 = arith.addf %46, %18 : vector<2x32x16xf32>
    %c0_16 = arith.constant 0 : index
    %c0_17 = arith.constant 0 : index
    %c0_18 = arith.constant 0 : index
    %48 = vector.load %arg5[%c0_16, %c0_17, %c0_18] : memref<2x32x16xf32, #tpu.memory_space<vmem>>, vector<2x32x16xf32>
    tpu.vector_store %arg5[%c0_16, %c0_17, %c0_18], %47 {strides = array<i32>} : memref<2x32x16xf32, #tpu.memory_space<vmem>>, vector<2x32x16xf32>,
    return
  }
}

</mosaic_0001>

<bundles_post_ra>
// kernel: tpu_custom_call.1
= control target key start
LH: loop header
LB: loop body
LE: loop exit
PB: predicated region body
PF: predicated region fallthrough
CT: control target
= control target key end

     0   :  { %s515_s22 = smov 127   ;;  %s516_s23 = smov 113   ;;  %vm37_vm0 = vcmask 7168   ;;  %vm52_vm1 = vcmask 121856   ;;  %vm59_vm2 = vcmask 1043456   ;;  %v519_v19 = vmov 0   ;;  %s785_s0 = inlined_call_operand.vmem [shape: f32[2,4,16], index: 0, kind: input, shape index: {}]   ;;  %s786_s2 = inlined_call_operand.vmem [shape: f32[64,1], index: 2, kind: input, shape index: {}]   ;;  %s787_s1 = inlined_call_operand.vmem [shape: bf16[64,12], index: 1, kind: input, shape index: {}]   ;;  %s788_s3 = inlined_call_operand.vmem [shape: f32[32,1], index: 3, kind: input, shape index: {}]   ;;  %s789_s4 = inlined_call_operand.vmem [shape: f32[32,1], index: 4, kind: input, shape index: {}]   ;;  %s790_s5 = inlined_call_operand.vmem [shape: f32[2,32,16], index: 5, kind: output, shape index: {}]  }
   0x1   :  { %v21_v0 = vld [vmem:[%s785_s0] sm:$0xf]  ;;  %v22_v1 = vld [vmem:[%s785_s0 + $0x4] sm:$0xf]  ;;  %s517_s24 = smov 15   ;;  %s518_s25 = smov 1   ;;  %504 = vset.pattern.permute.xlu1 %v519_v19  ;;  %503 = vset.pattern.permute.xlu0 %v519_v19 }
   0x2   :  { %v492_v2 = vpack.i.bf16 %v22_v1, %v21_v0  ;;  %v55_v6 = vrot.slane %v21_v0, 4  ;;  %v56_v7 = vrot.slane %v22_v1, 4  ;;  %v77_v13 = vld [vmem:[%s786_s2 + $0x18] sm:$0xff]  ;;  %v76_v14 = vld [vmem:[%s786_s2 + $0x10] sm:$0xff]  ;;  %v74_v20 = vld [vmem:[%s786_s2] sm:$0xff]  ;;  %502 = vset.pattern.permute.xlu2 %v519_v19  ;;  %vm160_vm3 = vcmask 1045504  }
   0x3   :  { %84 = vperm.xlu2 %502, %v74_v20   ;;  %v79_v35 = vld [vmem:[%s786_s2 + $0x28] sm:$0xff]  ;;  %v80_v36 = vld [vmem:[%s786_s2 + $0x30] sm:$0xff]  ;;  %v470_v41 = vld [vmem:[%s787_s1] sm:$0xff]  ;;  %vm147_vm4 = vcmask 97280   ;;  %vm238_vm5 = vcmask 130048  }
   0x4   :  { %493 = vrot.lane.b32.xlu1 %v492_v2, %s515_s22  ;;  %483 = vrot.lane.b32.xlu0 %v492_v2, %s516_s23  ;;  %v472_v42 = vld [vmem:[%s787_s1 + $0x10] sm:$0xff]  ;;  %v75_v43 = vld [vmem:[%s786_s2 + $0x8] sm:$0xff] }
   0x5   :  { %v362_v44 = vld [vmem:[%s788_s3] sm:$0xff]  ;;  %v363_v45 = vld [vmem:[%s788_s3 + $0x8] sm:$0xff]  ;;  %v473_v48 = vld [vmem:[%s787_s1 + $0x18] sm:$0xff] }
   0x6   :  { %v78_v46 = vld [vmem:[%s786_s2 + $0x20] sm:$0xff]  ;;  %v471_v47 = vld [vmem:[%s787_s1 + $0x8] sm:$0xff]  ;;  %v364_v49 = vld [vmem:[%s788_s3 + $0x10] sm:$0xff] }
   0xb   :  { %89 = vperm.xlu2 %502, %v75_v43  }
   0xc   :  { %498 = vrot.lane.b32.xlu1 %v492_v2, %s517_s24  ;;  %488 = vrot.lane.b32.xlu0 %v492_v2, %s518_s25 }
  0x13   :  { %104 = vperm.xlu2 %502, %v78_v46  }
  0x14   :  { %99 = vperm.xlu1 %504, %v77_v13   ;;  %94 = vperm.xlu0 %503, %v76_v14  }
  0x1b   :  { %378 = vperm.xlu2 %502, %v364_v49  }
  0x1c   :  { %109 = vperm.xlu1 %504, %v79_v35   ;;  %114 = vperm.xlu0 %503, %v80_v36  }
  0x24   :  { %368 = vperm.xlu1 %504, %v362_v44   ;;  %373 = vperm.xlu0 %503, %v363_v45  }
  0x5d   :  { %v85_v50 = vpop.permute.xlu2 %84 }
  0x65   :  { %v90_v60 = vpop.permute.xlu2 %89 }
  0x76   :  { %v494_v3 = vpop.permute.xlu1 %493  ;;  %v484_v4 = vpop.permute.xlu0 %483 }
  0x77   :  { %v496_v5 = vunpack.i.h.bf16 %v494_v3  ;;  %v495_v8 = vunpack.i.l.bf16 %v494_v3  ;;  %v486_v9 = vunpack.i.h.bf16 %v484_v4  ;;  %v485_v10 = vunpack.i.l.bf16 %v484_v4 }
  0x7e   :  { %v499_v11 = vpop.permute.xlu1 %498  ;;  %v489_v12 = vpop.permute.xlu0 %488 }
  0x7f   :  { %v501_v15 = vunpack.i.h.bf16 %v499_v11  ;;  %v500_v16 = vunpack.i.l.bf16 %v499_v11  ;;  %v491_v17 = vunpack.i.h.bf16 %v489_v12  ;;  %v490_v18 = vunpack.i.l.bf16 %v489_v12 }
  0x81   :  { %v38_v21 = vsel %vm37_vm0, %v485_v10, %v490_v18  ;;  %v39_v22 = vsel %vm37_vm0, %v486_v9, %v491_v17  ;;  %v53_v23 = vsel %vm52_vm1, %v495_v8, %v500_v16  ;;  %v54_v24 = vsel %vm52_vm1, %v496_v5, %v501_v15 }
  0x82   :  { %v60_v25 = vsel %vm59_vm2, %v38_v21, %v55_v6  ;;  %v63_v26 = vpack.c.bf16 %v53_v23, %v53_v23  ;;  %v61_v27 = vsel %vm59_vm2, %v39_v22, %v56_v7  ;;  %v65_v28 = vpack.c.bf16 %v54_v24, %v54_v24 }
  0x83   :  { %v62_v29 = vpack.c.bf16 %v60_v25, %v60_v25  ;;  %v64_v30 = vpack.c.bf16 %v61_v27, %v61_v27  ;;  %v365_v27 = vld [vmem:[%s788_s3 + $0x18] sm:$0xff] }
  0x84   :  { %v145_v31 = vunpack.c.l.b16 %v63_v26  ;;  %v196_v32 = vunpack.c.l.b16 %v65_v28  ;;  %v81_v26 = vld [vmem:[%s786_s2 + $0x38] sm:$0xff]  ;;  %v394_v28 = vld [vmem:[%s789_s4] sm:$0xff] }
  0x85   :  { %v144_v33 = vunpack.c.l.b16 %v62_v29  ;;  %v195_v34 = vunpack.c.l.b16 %v64_v30  ;;  %v520_v29 = vmov 32.0  }
  0x86   :  { %v95_v6 = vpop.permute.xlu0 %94  ;;  %v100_v16 = vpop.permute.xlu1 %99  ;;  %505 = vrcp.f32 %v520_v29 }
  0x87   :  { %v146_v37 = vpack.c.b16 %v145_v31, %v144_v33  ;;  %v197_v38 = vpack.c.b16 %v196_v32, %v195_v34  ;;  %v654_v31 = vpop.permute.xlu2 %104 }
  0x89   :  { %v162_v39 = vsel %vm160_vm3, %v146_v37, 0  ;;  %v199_v40 = vsel %vm160_vm3, %v197_v38, 0 }
  0x8a   :  { %171 = vmatpush.bf16.msra.mxu0 %v162_v39  ;;  %474 = vmatpush.bf16.msra.mxu2 %v162_v39 }
  0x8b   :  { %208 = vmatpush.bf16.msra.mxu1 %v199_v40  ;;  %475 = vmatpush.bf16.msra.mxu3 %v199_v40 }
  0x8c   :  { %v506_v30 = vpop.eup %505 }
  0x8d   :  { %462 = vmatmul.msk.bf16.vlgmr.msra.gmra.mxu0 %vm147_vm4, %v470_v41  ;;  %464 = vmatmul.msk.bf16.vlgmr.msra.gmra.mxu2 %vm147_vm4, %v472_v42  ;;  %v260_v32 = vmul.f32 32.0, %v506_v30  ;;  %vm264_vm6 = vweird.f32 %v506_v30 }
  0x8e   :  { %466 = vmatmul.msk.bf16.vlgmr.msra.gmra.mxu1 %vm147_vm4, %v470_v41  ;;  %468 = vmatmul.msk.bf16.vlgmr.msra.gmra.mxu3 %vm147_vm4, %v472_v42  ;;  %v656_v34 = vpop.permute.xlu1 %109  ;;  %v660_v38 = vpop.permute.xlu0 %114 }
  0x8f   :  { %v261_v33 = vsub.f32 1.0, %v260_v32  ;;  %v658_v36 = vpop.permute.xlu2 %378 }
  0x91   :  { %v262_v35 = vmul.f32 %v506_v30, %v261_v33 }
  0x93   :  { %v263_v37 = vadd.f32 %v506_v30, %v262_v35 }
  0x95   :  { %v662_v39 = vsel %vm264_vm6, %v506_v30, %v263_v37 }
  0x96   :  { %v664_v40 = vpop.permute.xlu1 %368  ;;  %v677_v49 = vpop.permute.xlu0 %373 }
  0x9d   :  { %463 = vmatmul.msk.bf16.gmra.mxu0 %vm147_vm4, %v471_v47  ;;  %465 = vmatmul.msk.bf16.gmra.mxu2 %vm147_vm4, %v473_v48 }
  0x9e   :  { %467 = vmatmul.msk.bf16.gmra.mxu1 %vm147_vm4, %v471_v47  ;;  %469 = vmatmul.msk.bf16.gmra.mxu3 %vm147_vm4, %v473_v48 }
 0x10a   :  { %v173_v51 = vpop.f32.mrf.mxu0 }
 0x10b   :  { %v613_v52 = vadd.f32 %v173_v51, %v85_v50  ;;  %v210_v53 = vpop.f32.mrf.mxu1 }
 0x10c   :  { %v615_v54 = vadd.f32 %v210_v53, %v85_v50 }
 0x10d   :  { %v230_v55 = vmax.f32 %v613_v52, 0.0 }
 0x10e   :  { %v234_v56 = vmax.f32 %v615_v54, 0.0 }
 0x10f   :  { %v239_v57 = vsel %vm238_vm5, %v230_v55, 0.0 }
 0x110   :  { %v240_v58 = vsel %vm238_vm5, %v234_v56, 0.0 }
 0x111   :  { %v241_v59 = vadd.f32 %v240_v58, %v239_v57 }
 0x112   :  { %v175_v61 = vpop.f32.mrf.mxu0 }
 0x113   :  { %v621_v62 = vadd.f32 %v175_v61, %v90_v60  ;;  %v212_v63 = vpop.f32.mrf.mxu1  ;;  %242 = vadd.xlane.f32.xlu2 %v241_v59 }
 0x114   :  { %v623_v0 = vadd.f32 %v212_v63, %v90_v60 }
 0x115   :  { %v231_v1 = vmax.f32 %v621_v62, 0.0 }
 0x116   :  { %v235_v2 = vmax.f32 %v623_v0, 0.0 }
 0x117   :  { %v244_v3 = vsel %vm238_vm5, %v231_v1, 0.0 }
 0x118   :  { %v245_v4 = vsel %vm238_vm5, %v235_v2, 0.0 }
 0x119   :  { %v246_v5 = vadd.f32 %v245_v4, %v244_v3 }
 0x11a   :  { %v178_v7 = vpop.f32.mrf.mxu0 }
 0x11b   :  { %v629_v8 = vadd.f32 %v178_v7, %v95_v6  ;;  %v215_v9 = vpop.f32.mrf.mxu1  ;;  %247 = vadd.xlane.f32.xlu1 %v246_v5 }
 0x11c   :  { %v631_v10 = vadd.f32 %v215_v9, %v95_v6 }
 0x11d   :  { %v232_v11 = vmax.f32 %v629_v8, 0.0 }
 0x11e   :  { %v236_v12 = vmax.f32 %v631_v10, 0.0 }
 0x11f   :  { %v249_v13 = vsel %vm238_vm5, %v232_v11, 0.0 }
 0x120   :  { %v250_v14 = vsel %vm238_vm5, %v236_v12, 0.0 }
 0x121   :  { %v251_v15 = vadd.f32 %v250_v14, %v249_v13  ;;  %v396_v14 = vld [vmem:[%s789_s4 + $0x10] sm:$0xff] }
 0x122   :  { %v180_v17 = vpop.f32.mrf.mxu0 }
 0x123   :  { %v637_v18 = vadd.f32 %v180_v17, %v100_v16  ;;  %v217_v19 = vpop.f32.mrf.mxu1  ;;  %252 = vadd.xlane.f32.xlu0 %v251_v15  ;;  %v395_v15 = vld [vmem:[%s789_s4 + $0x8] sm:$0xff] }
 0x124   :  { %v639_v20 = vadd.f32 %v217_v19, %v100_v16  ;;  %v397_v16 = vld [vmem:[%s789_s4 + $0x18] sm:$0xff] }
 0x125   :  { %v233_v21 = vmax.f32 %v637_v18, 0.0 }
 0x126   :  { %v237_v22 = vmax.f32 %v639_v20, 0.0 }
 0x127   :  { %v254_v23 = vsel %vm238_vm5, %v233_v21, 0.0 }
 0x128   :  { %v255_v24 = vsel %vm238_vm5, %v237_v22, 0.0 }
 0x129   :  { %v256_v25 = vadd.f32 %v255_v24, %v254_v23 }
 0x12b   :  { %257 = vadd.xlane.f32.xlu2 %v256_v25 }
 0x134   :  { %119 = vperm.xlu1 %504, %v81_v26  }
 0x137   :  { %383 = vperm.xlu0 %503, %v365_v27  }
 0x143   :  { %400 = vperm.xlu2 %502, %v394_v28  }
 0x186   :  { %v243_v41 = vpop.xlane.xlu2 %242 }
 0x187   :  { %v266_v42 = vmul.f32 %v662_v39, %v243_v41  ;;  %v183_v41 = vpop.f32.mrf.mxu2 }
 0x189   :  { %v667_v43 = vsub.f32 %v230_v55, %v266_v42  ;;  %v669_v44 = vsub.f32 %v234_v56, %v266_v42  ;;  %v220_v42 = vpop.f32.mrf.mxu3 }
 0x18b   :  { %v278_v45 = vmul.f32 %v667_v43, %v667_v43  ;;  %v282_v46 = vmul.f32 %v669_v44, %v669_v44 }
 0x18d   :  { %v286_v47 = vsel %vm238_vm5, %v278_v45, 0.0  ;;  %v287_v48 = vsel %vm238_vm5, %v282_v46, 0.0 }
 0x18e   :  { %v248_v50 = vpop.xlane.xlu1 %247  ;;  %v288_v51 = vadd.f32 %v287_v48, %v286_v47 }
 0x18f   :  { %v267_v52 = vmul.f32 %v662_v39, %v248_v50 }
 0x190   :  { %289 = vadd.xlane.f32.xlu2 %v288_v51 }
 0x191   :  { %v680_v53 = vsub.f32 %v231_v1, %v267_v52  ;;  %v682_v54 = vsub.f32 %v235_v2, %v267_v52 }
 0x193   :  { %v279_v55 = vmul.f32 %v680_v53, %v680_v53  ;;  %v283_v56 = vmul.f32 %v682_v54, %v682_v54 }
 0x195   :  { %v291_v57 = vsel %vm238_vm5, %v279_v55, 0.0  ;;  %v292_v58 = vsel %vm238_vm5, %v283_v56, 0.0 }
 0x196   :  { %v253_v59 = vpop.xlane.xlu0 %252  ;;  %v293_v60 = vadd.f32 %v292_v58, %v291_v57 }
 0x197   :  { %v268_v61 = vmul.f32 %v662_v39, %v253_v59  ;;  %v184_v59 = vadd.f32 %v183_v41, %v654_v31 }
 0x198   :  { %294 = vadd.xlane.f32.xlu1 %v293_v60 }
 0x199   :  { %v691_v62 = vsub.f32 %v232_v11, %v268_v61  ;;  %v693_v63 = vsub.f32 %v236_v12, %v268_v61 }
 0x19b   :  { %v280_v0 = vmul.f32 %v691_v62, %v691_v62  ;;  %v284_v1 = vmul.f32 %v693_v63, %v693_v63 }
 0x19d   :  { %v296_v2 = vsel %vm238_vm5, %v280_v0, 0.0  ;;  %v297_v3 = vsel %vm238_vm5, %v284_v1, 0.0  ;;  %v221_v0 = vadd.f32 %v220_v42, %v654_v31 }
 0x19e   :  { %v258_v4 = vpop.xlane.xlu2 %257  ;;  %v298_v5 = vadd.f32 %v297_v3, %v296_v2 }
 0x19f   :  { %v269_v6 = vmul.f32 %v662_v39, %v258_v4 }
 0x1a0   :  { %299 = vadd.xlane.f32.xlu0 %v298_v5 }
 0x1a1   :  { %v702_v7 = vsub.f32 %v233_v21, %v269_v6  ;;  %v704_v8 = vsub.f32 %v237_v22, %v269_v6  ;;  %v222_v6 = vpop.f32.mrf.mxu3 }
 0x1a3   :  { %v281_v9 = vmul.f32 %v702_v7, %v702_v7  ;;  %v285_v10 = vmul.f32 %v704_v8, %v704_v8 }
 0x1a5   :  { %v301_v11 = vsel %vm238_vm5, %v281_v9, 0.0  ;;  %v302_v12 = vsel %vm238_vm5, %v285_v10, 0.0 }
 0x1a6   :  { %v303_v13 = vadd.f32 %v302_v12, %v301_v11  ;;  %v401_v17 = vpop.permute.xlu2 %400  ;;  %v721_v18 = vpop.permute.xlu1 %119 }
 0x1a8   :  { %304 = vadd.xlane.f32.xlu2 %v303_v13 }
 0x1a9   :  { %v724_v22 = vpop.permute.xlu0 %383 }
 0x1b1   :  { %410 = vperm.xlu1 %504, %v396_v14  }
 0x1b4   :  { %405 = vperm.xlu0 %503, %v395_v15  }
 0x1c0   :  { %415 = vperm.xlu2 %502, %v397_v16  }
 0x203   :  { %v290_v19 = vpop.xlane.xlu2 %289 }
 0x204   :  { %v306_v20 = vmul.f32 %v290_v19, %v662_v39 }
 0x206   :  { %v310_v21 = vadd.f32 1e-05, %v306_v20  ;;  %v223_v20 = vadd.f32 %v222_v6, %v656_v34 }
 0x208   :  { %507 = vrsqrt.f32 %v310_v21  ;;  %vm320_vm8 = vweird.f32 %v310_v21 }
 0x20b   :  { %v295_v23 = vpop.xlane.xlu1 %294 }
 0x20c   :  { %v307_v24 = vmul.f32 %v295_v23, %v662_v39 }
 0x20e   :  { %v508_v25 = vpop.eup %507  ;;  %v311_v26 = vadd.f32 1e-05, %v307_v24 }
 0x20f   :  { %v315_v27 = vmul.f32 %v508_v25, %v310_v21  ;;  %vm321_vm7 = vweird.f32 %v508_v25 }
 0x210   :  { %509 = vrsqrt.f32 %v311_v26  ;;  %vm322_vm9 = vmor %vm320_vm8, %vm321_vm7  ;;  %vm330_vm11 = vweird.f32 %v311_v26 }
 0x211   :  { %v316_v28 = vmul.f32 %v508_v25, %v315_v27 }
 0x213   :  { %v317_v29 = vmul.f32 0.5, %v316_v28  ;;  %v300_v30 = vpop.xlane.xlu0 %299 }
 0x214   :  { %v308_v32 = vmul.f32 %v300_v30, %v662_v39 }
 0x215   :  { %v318_v33 = vsub.f32 1.5, %v317_v29  ;;  %v225_v29 = vpop.f32.mrf.mxu3 }
 0x216   :  { %v510_v35 = vpop.eup %509  ;;  %v312_v37 = vadd.f32 1e-05, %v308_v32 }
 0x217   :  { %v319_v45 = vmul.f32 %v508_v25, %v318_v33  ;;  %v325_v46 = vmul.f32 %v510_v35, %v311_v26  ;;  %vm331_vm10 = vweird.f32 %v510_v35 }
 0x218   :  { %511 = vrsqrt.f32 %v312_v37  ;;  %vm332_vm12 = vmor %vm330_vm11, %vm331_vm10  ;;  %vm340_vm14 = vweird.f32 %v312_v37 }
 0x219   :  { %v323_v47 = vsel %vm322_vm9, %v508_v25, %v319_v45  ;;  %v326_v48 = vmul.f32 %v510_v35, %v325_v46 }
 0x21a   :  { %v354_v50 = vmul.f32 %v323_v47, %v667_v43  ;;  %v358_v51 = vmul.f32 %v323_v47, %v669_v44 }
 0x21b   :  { %v327_v52 = vmul.f32 0.5, %v326_v48  ;;  %v305_v55 = vpop.xlane.xlu2 %304 }
 0x21c   :  { %v386_v56 = vmul.f32 %v664_v40, %v354_v50  ;;  %v390_v57 = vmul.f32 %v664_v40, %v358_v51  ;;  %v309_v58 = vmul.f32 %v305_v55, %v662_v39  ;;  %v185_v40 = vpop.f32.mrf.mxu2 }
 0x21d   :  { %v328_v60 = vsub.f32 1.5, %v327_v52  ;;  %v186_v16 = vadd.f32 %v185_v40, %v656_v34  ;;  %v227_v51 = vpop.f32.mrf.mxu3 }
 0x21e   :  { %v512_v61 = vpop.eup %511  ;;  %v418_v1 = vadd.f32 %v401_v17, %v386_v56  ;;  %v422_v2 = vadd.f32 %v401_v17, %v390_v57  ;;  %v313_v43 = vadd.f32 1e-05, %v309_v58  ;;  %v228_v57 = vadd.f32 %v227_v51, %v721_v18 }
 0x21f   :  { %v335_v44 = vmul.f32 %v512_v61, %v312_v37  ;;  %v329_v3 = vmul.f32 %v510_v35, %v328_v60  ;;  %vm341_vm13 = vweird.f32 %v512_v61 }
 0x220   :  { %v426_v4 = vadd.f32 %v418_v1, %v184_v59  ;;  %v430_v5 = vadd.f32 %v422_v2, %v221_v0  ;;  %513 = vrsqrt.f32 %v313_v43  ;;  %vm342_vm15 = vmor %vm340_vm14, %vm341_vm13  ;;  %vm350_vm1 = vweird.f32 %v313_v43 }
 0x221   :  { %v336_v39 = vmul.f32 %v512_v61, %v335_v44  ;;  %v333_v9 = vsel %vm332_vm12, %v510_v35, %v329_v3  ;;  %v226_v35 = vadd.f32 %v225_v29, %v660_v38 }
 0x222   :  { %434 = vst.msk [vmem:[%s790_s5] sm:$0xff] %vm238_vm5, %v426_v4  ;;  %v355_v31 = vmul.f32 %v333_v9, %v680_v53  ;;  %v359_v10 = vmul.f32 %v333_v9, %v682_v54 }
 0x223   :  { %438 = vst.msk [vmem:[%s790_s5 + $0x20] sm:$0xff] %vm238_vm5, %v430_v5  ;;  %v337_v11 = vmul.f32 0.5, %v336_v39  ;;  %v416_v55 = vpop.permute.xlu2 %415 }
 0x224   :  { %v387_v12 = vmul.f32 %v677_v49, %v355_v31  ;;  %v391_v13 = vmul.f32 %v677_v49, %v359_v10  ;;  %v188_v28 = vpop.f32.mrf.mxu2 }
 0x225   :  { %v338_v14 = vsub.f32 1.5, %v337_v11  ;;  %v189_v33 = vadd.f32 %v188_v28, %v660_v38 }
 0x226   :  { %v514_v15 = vpop.eup %513  ;;  %v406_v17 = vpop.permute.xlu0 %405 }
 0x227   :  { %v345_v53 = vmul.f32 %v514_v15, %v313_v43  ;;  %v339_v19 = vmul.f32 %v512_v61, %v338_v14  ;;  %v419_v54 = vadd.f32 %v406_v17, %v387_v12  ;;  %v423_v21 = vadd.f32 %v406_v17, %v391_v13 }
 0x228   :  { %vm351_vm0 = vweird.f32 %v514_v15 }
 0x229   :  { %v346_v23 = vmul.f32 %v514_v15, %v345_v53  ;;  %v343_v24 = vsel %vm342_vm15, %v512_v61, %v339_v19  ;;  %v427_v25 = vadd.f32 %v419_v54, %v186_v16  ;;  %v431_v27 = vadd.f32 %v423_v21, %v223_v20  ;;  %vm352_vm2 = vmor %vm350_vm1, %vm351_vm0 }
 0x22a   :  { %v356_v26 = vmul.f32 %v343_v24, %v691_v62  ;;  %v360_v49 = vmul.f32 %v343_v24, %v693_v63  ;;  %v411_v63 = vpop.permute.xlu1 %410 }
 0x22b   :  { %v347_v30 = vmul.f32 0.5, %v346_v23  ;;  %435 = vst.msk [vmem:[%s790_s5 + $0x8] sm:$0xff] %vm238_vm5, %v427_v25 }
 0x22c   :  { %v388_v34 = vmul.f32 %v658_v36, %v356_v26  ;;  %v392_v32 = vmul.f32 %v658_v36, %v360_v49  ;;  %439 = vst.msk [vmem:[%s790_s5 + $0x28] sm:$0xff] %vm238_vm5, %v431_v27  ;;  %v190_v50 = vpop.f32.mrf.mxu2 }
 0x22d   :  { %v348_v62 = vsub.f32 1.5, %v347_v30  ;;  %v191_v56 = vadd.f32 %v190_v50, %v721_v18 }
 0x22e   :  { %v420_v37 = vadd.f32 %v411_v63, %v388_v34  ;;  %v424_v41 = vadd.f32 %v411_v63, %v392_v32 }
 0x22f   :  { %v349_v42 = vmul.f32 %v514_v15, %v348_v62 }
 0x230   :  { %v428_v45 = vadd.f32 %v420_v37, %v189_v33  ;;  %v432_v46 = vadd.f32 %v424_v41, %v226_v35 }
 0x231   :  { %v353_v36 = vsel %vm352_vm2, %v514_v15, %v349_v42 }
 0x232   :  { %436 = vst.msk [vmem:[%s790_s5 + $0x10] sm:$0xff] %vm238_vm5, %v428_v45  ;;  %v357_v47 = vmul.f32 %v353_v36, %v702_v7  ;;  %v361_v48 = vmul.f32 %v353_v36, %v704_v8 }
 0x233   :  { %440 = vst.msk [vmem:[%s790_s5 + $0x30] sm:$0xff] %vm238_vm5, %v432_v46 }
 0x234   :  { %v389_v38 = vmul.f32 %v724_v22, %v357_v47  ;;  %v393_v52 = vmul.f32 %v724_v22, %v361_v48 }
 0x236   :  { %v421_v58 = vadd.f32 %v416_v55, %v389_v38  ;;  %v425_v7 = vadd.f32 %v416_v55, %v393_v52 }
 0x238   :  { %v429_v59 = vadd.f32 %v421_v58, %v191_v56  ;;  %v433_v8 = vadd.f32 %v425_v7, %v228_v57 }
 0x23a   :  { %437 = vst.msk [vmem:[%s790_s5 + $0x18] sm:$0xff] %vm238_vm5, %v429_v59 }
 0x23b   :  { %441 = vst.msk [vmem:[%s790_s5 + $0x38] sm:$0xff] %vm238_vm5, %v433_v8 }

</bundles_post_ra>
